<compile_context>
chip_gen: v5e
topology: v5e:2x2
jax: 0.10.0
libtpu: 0.0.40
codegen_flags: <defaults>
</compile_context>

<pallas_src>
import jax
import jax.numpy as jnp
from jax.experimental import pallas as pl
from jax.experimental.pallas import tpu as pltpu


def _round_up(x, m):
    return ((x + m - 1) // m) * m


def _classifier_kernel(x_ref, wh_t_ref, bh_ref, wn_t_ref, bo_ref, o_ref):
    # hidden Linear: x @ Wh^T + bh (bf16 MXU, f32 accumulate)
    h = jnp.dot(x_ref[...], wh_t_ref[...], preferred_element_type=jnp.float32)
    h = h + bh_ref[...]                                  # (1, Fi) broadcasts

    # leaky_relu, negative_slope = 0.01
    h = jnp.where(h > 0, h, 0.01 * h)

    # BatchNorm (eval) already folded into wn_t / bo offline.
    out = jnp.dot(h.astype(jnp.bfloat16), wn_t_ref[...],
                  preferred_element_type=jnp.float32)
    o_ref[...] = (out + bo_ref[...]).astype(o_ref.dtype)


def classifier_forward(x, params, *, block_b=256, eps=1e-5):
    """x: (B, in_features) float32. params: see init_params()."""
    B, F_in = x.shape
    F_out = params["wn_t"].shape[1]

    # ---- fold BatchNorm (eval) into the weight-normalized output linear ----
    scale = params["gamma"] * jax.lax.rsqrt(params["var"] + eps)   # (1, F_in)
    shift = params["beta"] - params["mean"] * scale                # (1, F_in)
    wn_t_folded = params["wn_t"] * scale.reshape(F_in, 1)          # (F_in, F_out)
    bo_folded = params["bo"] + shift @ params["wn_t"]              # (1, F_out)

    # ---- pad to lane-dense / MXU-friendly shapes ----
    Fi = _round_up(F_in, 128)
    Fo = _round_up(F_out, 128)
    B8 = _round_up(B, 8)
    TB = min(block_b, B8)          # batch tile (multiple of 8)
    Bp = _round_up(B8, TB)

    x_p = jnp.zeros((Bp, Fi), jnp.bfloat16).at[:B, :F_in].set(
        x.astype(jnp.bfloat16))
    wh_t_p = jnp.zeros((Fi, Fi), jnp.bfloat16).at[:F_in, :F_in].set(
        params["wh_t"].astype(jnp.bfloat16))
    bh_p = jnp.zeros((1, Fi), jnp.float32).at[:, :F_in].set(params["bh"])
    wn_t_p = jnp.zeros((Fi, Fo), jnp.bfloat16).at[:F_in, :F_out].set(
        wn_t_folded.astype(jnp.bfloat16))
    bo_p = jnp.zeros((1, Fo), jnp.float32).at[:, :F_out].set(bo_folded)

    grid = (Bp // TB,)

    # VMEM budget: resident weights + double-buffered x/out tiles + headroom.
    tile_bytes = TB * Fi * 2 + TB * Fo * 4
    weight_bytes = Fi * Fi * 2 + Fi * Fo * 2 + Fi * 4 + Fo * 4
    vmem_bytes = int(min(2 * (tile_bytes + weight_bytes) + (4 << 20), 64 << 20))

    cost = pl.CostEstimate(
        flops=2 * B * F_in * (F_in + F_out),
        transcendentals=0,
        bytes_accessed=(B * F_in * 4 + F_in * F_in * 4 + F_in * F_out * 4
                        + B * F_out * 4),
    )

    out_p = pl.pallas_call(
        _classifier_kernel,
        out_shape=jax.ShapeDtypeStruct((Bp, Fo), jnp.float32),
        grid=grid,
        in_specs=[
            pl.BlockSpec((TB, Fi), lambda i: (i, 0)),   # x: batch-tiled
            pl.BlockSpec((Fi, Fi), lambda i: (0, 0)),   # hidden weight (resident)
            pl.BlockSpec((1, Fi), lambda i: (0, 0)),    # hidden bias
            pl.BlockSpec((Fi, Fo), lambda i: (0, 0)),   # BN-folded output weight
            pl.BlockSpec((1, Fo), lambda i: (0, 0)),    # BN-folded output bias
        ],
        out_specs=pl.BlockSpec((TB, Fo), lambda i: (i, 0)),
        compiler_params=pltpu.CompilerParams(
            dimension_semantics=("parallel",),
            vmem_limit_bytes=vmem_bytes),
        cost_estimate=cost,
    )(x_p, wh_t_p, bh_p, wn_t_p, bo_p)

    return out_p[:B, :F_out]


def init_params(key, in_features, out_features):
    """Deterministic synthetic parameters matching Classifier.__init__ shapes."""
    k_wh, k_bh, k_v = jax.random.split(key, 3)

    # hidden = nn.Linear(in_features, in_features)
    bound = 1.0 / jnp.sqrt(in_features)
    wh = jax.random.uniform(k_wh, (in_features, in_features),
                            minval=-bound, maxval=bound, dtype=jnp.float32)
    bh = jax.random.uniform(k_bh, (1, in_features),
                            minval=-bound, maxval=bound, dtype=jnp.float32)

    # batch_norm = nn.BatchNorm1d(in_features): gamma=1, beta=0, mean=0, var=1
    gamma = jnp.ones((1, in_features), jnp.float32)
    beta = jnp.zeros((1, in_features), jnp.float32)
    mean = jnp.zeros((1, in_features), jnp.float32)
    var = jnp.ones((1, in_features), jnp.float32)

    # linear = weight_norm(nn.Linear(in, out), dim=0), g == 1, bias == -1
    v = jax.random.uniform(k_v, (out_features, in_features),
                           minval=-bound, maxval=bound, dtype=jnp.float32)
    row_norm = jnp.sqrt(jnp.sum(v * v, axis=1, keepdims=True))
    wn = v / row_norm
    bo = jnp.full((1, out_features), -1.0, jnp.float32)

    return {
        "wh_t": wh.T, "bh": bh,
        "gamma": gamma, "beta": beta, "mean": mean, "var": var,
        "wn_t": wn.T, "bo": bo,
    }


def reference_forward(x, params, eps=1e-5):
    h = x @ params["wh_t"] + params["bh"]
    h = jnp.where(h > 0, h, 0.01 * h)
    h = (h - params["mean"]) * jax.lax.rsqrt(params["var"] + eps) \
        * params["gamma"] + params["beta"]
    return h @ params["wn_t"] + params["bo"]


if __name__ == "__main__":
    B, IN_FEATURES, OUT_FEATURES = 8, 32, 16

    key = jax.random.PRNGKey(0)
    k_x, k_p = jax.random.split(key)
    x = jax.random.normal(k_x, (B, IN_FEATURES), dtype=jnp.float32)
    params = init_params(k_p, IN_FEATURES, OUT_FEATURES)

    out = classifier_forward(x, params)
    out = jax.block_until_ready(out)

    ref = reference_forward(x, params)
    assert out.shape == (B, OUT_FEATURES)
    # bf16 MXU inputs with f32 accumulation -> loosened tolerance.
    assert jnp.allclose(out, ref, atol=5e-2, rtol=5e-2)

    print("KERNEL_OK")
</pallas_src>

<mosaic_0001>
module attributes {stable_mosaic.version = 11 : i64} {
  func.func @_classifier_kernel(%arg0: i32, %arg1: memref<8x128xbf16, #tpu.memory_space<vmem>>, %arg2: memref<128x128xbf16, #tpu.memory_space<vmem>>, %arg3: memref<1x128xf32, #tpu.memory_space<vmem>>, %arg4: memref<128x128xbf16, #tpu.memory_space<vmem>>, %arg5: memref<1x128xf32, #tpu.memory_space<vmem>>, %arg6: memref<8x128xf32, #tpu.memory_space<vmem>>) attributes {dimension_semantics = [#tpu.dimension_semantics<parallel>], iteration_bounds = array<i64: 1>, scalar_prefetch = 0 : i64, scratch_operands = 0 : i64, tpu.core_type = #tpu.core_type<tc>, window_params = [{transform_indices = @transform_0, window_bounds = array<i64: 8, 128>}, {pipeline_mode = #tpu.pipeline_mode<synchronous>, transform_indices = @transform_1, window_bounds = array<i64: 128, 128>}, {pipeline_mode = #tpu.pipeline_mode<synchronous>, transform_indices = @transform_2, window_bounds = array<i64: 1, 128>}, {pipeline_mode = #tpu.pipeline_mode<synchronous>, transform_indices = @transform_3, window_bounds = array<i64: 128, 128>}, {pipeline_mode = #tpu.pipeline_mode<synchronous>, transform_indices = @transform_4, window_bounds = array<i64: 1, 128>}, {transform_indices = @transform_5, window_bounds = array<i64: 8, 128>}]} {
    %c0 = arith.constant 0 : index
    %c0_0 = arith.constant 0 : index
    %0 = vector.load %arg1[%c0, %c0_0] : memref<8x128xbf16, #tpu.memory_space<vmem>>, vector<8x128xbf16>
    %c0_1 = arith.constant 0 : index
    %c0_2 = arith.constant 0 : index
    %1 = vector.load %arg2[%c0_1, %c0_2] : memref<128x128xbf16, #tpu.memory_space<vmem>>, vector<128x128xbf16>
    %cst = arith.constant dense<0.000000e+00> : vector<8x128xf32>
    %2 = tpu.matmul %0, %1, %cst {dimension_numbers = #tpu.dot_dimension_numbers<[1], [0], [0], [1], [0, 0, 1, 1], [], []>} : vector<8x128xbf16>, vector<128x128xbf16>, vector<8x128xf32> -> vector<8x128xf32>
    %c0_3 = arith.constant 0 : index
    %c0_4 = arith.constant 0 : index
    %3 = vector.load %arg3[%c0_3, %c0_4] : memref<1x128xf32, #tpu.memory_space<vmem>>, vector<1x128xf32>
    %4 = vector.broadcast %3 : vector<1x128xf32> to vector<8x128xf32>
    %5 = arith.addf %2, %4 : vector<8x128xf32>
    %cst_5 = arith.constant 0.000000e+00 : f32
    %6 = vector.broadcast %cst_5 : f32 to vector<8x128xf32>
    %7 = arith.cmpf ogt, %5, %6 : vector<8x128xf32>
    %cst_6 = arith.constant 0.00999999977 : f32
    %8 = vector.broadcast %cst_6 : f32 to vector<8x128xf32>
    %9 = arith.mulf %8, %5 : vector<8x128xf32>
    %10 = arith.select %7, %5, %9 : vector<8x128xi1>, vector<8x128xf32>
    %11 = arith.truncf %10 : vector<8x128xf32> to vector<8x128xbf16>
    %c0_7 = arith.constant 0 : index
    %c0_8 = arith.constant 0 : index
    %12 = vector.load %arg4[%c0_7, %c0_8] : memref<128x128xbf16, #tpu.memory_space<vmem>>, vector<128x128xbf16>
    %cst_9 = arith.constant dense<0.000000e+00> : vector<8x128xf32>
    %13 = tpu.matmul %11, %12, %cst_9 {dimension_numbers = #tpu.dot_dimension_numbers<[1], [0], [0], [1], [0, 0, 1, 1], [], []>} : vector<8x128xbf16>, vector<128x128xbf16>, vector<8x128xf32> -> vector<8x128xf32>
    %c0_10 = arith.constant 0 : index
    %c0_11 = arith.constant 0 : index
    %14 = vector.load %arg5[%c0_10, %c0_11] : memref<1x128xf32, #tpu.memory_space<vmem>>, vector<1x128xf32>
    %15 = vector.broadcast %14 : vector<1x128xf32> to vector<8x128xf32>
    %16 = arith.addf %13, %15 : vector<8x128xf32>
    %c0_12 = arith.constant 0 : index
    %c0_13 = arith.constant 0 : index
    %17 = vector.load %arg6[%c0_12, %c0_13] : memref<8x128xf32, #tpu.memory_space<vmem>>, vector<8x128xf32>
    tpu.vector_store %arg6[%c0_12, %c0_13], %16 {strides = array<i32>} : memref<8x128xf32, #tpu.memory_space<vmem>>, vector<8x128xf32>,
    return
  }
  func.func @transform_0(%arg0: i32) -> (i32, i32) {
    %c0_i32 = arith.constant 0 : i32
    %c0_i32_0 = arith.constant 0 : i32
    return %arg0, %c0_i32 : i32, i32
  }
  func.func @transform_1(%arg0: i32) -> (i32, i32) {
    %c0_i32 = arith.constant 0 : i32
    %c0_i32_0 = arith.constant 0 : i32
    %c0_i32_1 = arith.constant 0 : i32
    return %c0_i32, %c0_i32_0 : i32, i32
  }
  func.func @transform_2(%arg0: i32) -> (i32, i32) {
    %c0_i32 = arith.constant 0 : i32
    %c0_i32_0 = arith.constant 0 : i32
    %c0_i32_1 = arith.constant 0 : i32
    return %c0_i32, %c0_i32_0 : i32, i32
  }
  func.func @transform_3(%arg0: i32) -> (i32, i32) {
    %c0_i32 = arith.constant 0 : i32
    %c0_i32_0 = arith.constant 0 : i32
    %c0_i32_1 = arith.constant 0 : i32
    return %c0_i32, %c0_i32_0 : i32, i32
  }
  func.func @transform_4(%arg0: i32) -> (i32, i32) {
    %c0_i32 = arith.constant 0 : i32
    %c0_i32_0 = arith.constant 0 : i32
    %c0_i32_1 = arith.constant 0 : i32
    return %c0_i32, %c0_i32_0 : i32, i32
  }
  func.func @transform_5(%arg0: i32) -> (i32, i32) {
    %c0_i32 = arith.constant 0 : i32
    %c0_i32_0 = arith.constant 0 : i32
    return %arg0, %c0_i32 : i32, i32
  }
}

</mosaic_0001>

<bundles_post_ra>
// kernel: tpu_custom_call.1
= control target key start
LH: loop header
LB: loop body
LE: loop exit
PB: predicated region body
PF: predicated region fallthrough
CT: control target
= control target key end

     0   :  { %10 = vsyncpa [#allocation3], 0  ;;  %s496_s0 = inlined_call_operand.hbm [shape: bf16[8,128], index: 0, kind: input, shape index: {}]   ;;  %s497_s1 = inlined_call_operand.hbm [shape: bf16[128,128], index: 1, kind: input, shape index: {}]   ;;  %s498_s2 = inlined_call_operand.vmem [shape: f32[1,128], index: 2, kind: input, shape index: {}]   ;;  %s499_s3 = inlined_call_operand.hbm [shape: bf16[128,128], index: 3, kind: input, shape index: {}]   ;;  %s500_s4 = inlined_call_operand.vmem [shape: f32[1,128], index: 4, kind: input, shape index: {}]   ;;  %s501_s5 = inlined_call_operand.hbm [shape: f32[8,128], index: 5, kind: output, shape index: {}]  }
   0x1   :  { %11 = vsyncpa [#allocation6], 0  ;;  %s28_s20 = sshll.u32 %s497_s1, 4  ;;  %s29_s20 = int_to_ptr.hbm [resolvable:$true] %s28_s20 }
   0x2   :  { %12 = vsyncpa [#allocation4], 0  ;;  %s442_s21 = smov [#allocation5]   ;;  %s18_s25 = sshll.u32 %s496_s0, 4  ;;  %s19_s25 = int_to_ptr.hbm [resolvable:$true] %s18_s25 }
   0x3   :  { %s30_s22 = sshll.u32 %s442_s21, 4  ;;  %s443_s26 = smov 64   ;;  %s31_s22 = int_to_ptr.vmem [resolvable:$true] %s30_s22 }
   0x4   :  { %s444_s27 = smov 4   ;;  %s445_s28 = smov [#allocation2]  }
   0x5   :  { %36 = dma.hbm_to_vmem [thread:$0]  %s29_s20, 1024, %s31_s22, [#allocation6], %s443_s26, %s443_s26, %s444_s27  }
   0x6   :  { %s20_s29 = sshll.u32 %s445_s28, 4  ;;  %s43_s7 = sshll.u32 %s499_s3, 4  ;;  %s21_s29 = int_to_ptr.vmem [resolvable:$true] %s20_s29  ;;  %s44_s7 = int_to_ptr.hbm [resolvable:$true] %s43_s7 }
   0x7   :  { %23 = dma.hbm_to_vmem [thread:$0]  %s19_s25, 64, %s21_s29, [#allocation3]  }
   0x8   :  { %s446_s1 = smov [#allocation7]  }
   0x9   :  { %s45_s8 = sshll.u32 %s446_s1, 4  ;;  %s46_s8 = int_to_ptr.vmem [resolvable:$true] %s45_s8 }
   0xa   :  { %51 = dma.hbm_to_vmem [thread:$0]  %s44_s7, 1024, %s46_s8, [#allocation6], %s443_s26, %s443_s26, %s444_s27  }
   0xb   :  { %436 = dma.done.wait [#allocation3], 64  }
   0xc   :  { %437 = vsyncadd [#allocation3], 4294967232 }
   0xd   :  { %438 = dma.done.wait [#allocation6], 2048  }
   0xe   :  { %439 = vsyncadd [#allocation6], 4294965248  ;;  %v323_v0 = vld [vmem:[#allocation5 + $0x38] sm:$0xff]  ;;  %v322_v1 = vld [vmem:[#allocation5 + $0x30] sm:$0xff]  ;;  %s447_s11 = smov [#allocation8]   ;;  %s241_s15 = sshll.u32 %s501_s5, 4  ;;  %s242_s15 = int_to_ptr.hbm [resolvable:$true] %s241_s15 }
   0xf   :  { %135 = vmatpush.bf16.msra.mxu0 %v323_v0  ;;  %v331_v2 = vld [vmem:[#allocation7 + $0x38] sm:$0xff]  ;;  %v330_v3 = vld [vmem:[#allocation7 + $0x30] sm:$0xff]  ;;  %v321_v4 = vld [vmem:[#allocation5 + $0x28] sm:$0xff]  ;;  %s239_s12 = sshll.u32 %s447_s11, 4  ;;  %s240_s12 = int_to_ptr.vmem [resolvable:$true] %s239_s12 }
  0x10   :  { %220 = vmatpush.bf16.msra.mxu1 %v331_v2  ;;  %v329_v5 = vld [vmem:[#allocation7 + $0x28] sm:$0xff]  ;;  %v320_v6 = vld [vmem:[#allocation5 + $0x20] sm:$0xff]  ;;  %v319_v8 = vld [vmem:[#allocation5 + $0x18] sm:$0xff] }
  0x11   :  { %v328_v7 = vld [vmem:[#allocation7 + $0x20] sm:$0xff]  ;;  %v327_v9 = vld [vmem:[#allocation7 + $0x18] sm:$0xff]  ;;  %v318_v10 = vld [vmem:[#allocation5 + $0x10] sm:$0xff] }
  0x12   :  { %v326_v11 = vld [vmem:[#allocation7 + $0x10] sm:$0xff]  ;;  %v317_v12 = vld [vmem:[#allocation5 + $0x8] sm:$0xff]  ;;  %v316_v13 = vld [vmem:[#allocation5] sm:$0xff] }
  0x13   :  { %136 = vmatpush.bf16.msra.mxu0 %v322_v1  ;;  %v66_v14 = vld [vmem:[#allocation2] sm:$0xf]  ;;  %v325_v15 = vld [vmem:[#allocation7 + $0x8] sm:$0xff]  ;;  %v324_v16 = vld [vmem:[#allocation7] sm:$0xff] }
  0x14   :  { %221 = vmatpush.bf16.msra.mxu1 %v330_v3  ;;  %v338_v17 = vld [vmem:[%s498_s2] ss:$0 sm:$0xff] }
  0x15   :  { %v339_v24 = vld [vmem:[%s500_s4] ss:$0 sm:$0xff] }
  0x17   :  { %137 = vmatpush.bf16.msra.mxu0 %v321_v4 }
  0x18   :  { %222 = vmatpush.bf16.msra.mxu1 %v329_v5 }
  0x1b   :  { %138 = vmatpush.bf16.msra.mxu0 %v320_v6 }
  0x1c   :  { %223 = vmatpush.bf16.msra.mxu1 %v328_v7 }
  0x1f   :  { %139 = vmatpush.bf16.msra.mxu0 %v319_v8 }
  0x20   :  { %224 = vmatpush.bf16.msra.mxu1 %v327_v9 }
  0x23   :  { %140 = vmatpush.bf16.msra.mxu0 %v318_v10 }
  0x24   :  { %225 = vmatpush.bf16.msra.mxu1 %v326_v11 }
  0x27   :  { %141 = vmatpush.bf16.msra.mxu0 %v317_v12 }
  0x28   :  { %226 = vmatpush.bf16.msra.mxu1 %v325_v15 }
  0x2b   :  { %142 = vmatpush.bf16.msra.mxu0 %v316_v13 }
  0x2c   :  { %227 = vmatpush.bf16.msra.mxu1 %v324_v16 }
  0x2e   :  { %143 = vmatmul.bf16.vlgmr.msra.gmra.mxu0 %v66_v14 }
  0xab   :  { %v144_v18 = vpop.f32.mrf.mxu0 }
  0xac   :  { %v145_v19 = vadd.f32 %v338_v17, %v144_v18 }
  0xae   :  { %v149_v20 = vmul.f32 0.01, %v145_v19  ;;  %vm148_vm0 = vcmp.gt.f32.partialorder %v145_v19, 0.0 }
  0xb0   :  { %v150_v21 = vsel %vm148_vm0, %v145_v19, %v149_v20 }
  0xb1   :  { %v151_v22 = vpack.c.bf16 %v150_v21, %v150_v21 }
  0xb3   :  { %v146_v23 = vpop.f32.mrf.mxu0  ;;  %228 = vmatmul.bf16.vlgmr.msra.gmra.mxu1 %v151_v22 }
 0x130   :  { %v229_v25 = vpop.f32.mrf.mxu1 }
 0x131   :  { %v230_v26 = vadd.f32 %v339_v24, %v229_v25 }
 0x133   :  { %233 = vst [vmem:[#allocation8] sm:$0xff] %v230_v26 }
 0x134   :  { %244 = dma.vmem_to_hbm [thread:$0]  %s240_s12, 128, %s242_s15, [#allocation4]  }
 0x138   :  { %v231_v27 = vpop.f32.mrf.mxu1 }
 0x139   :  { %440 = dma.done.wait [#allocation4], 128  }
 0x13a   :  { %441 = vsyncadd [#allocation4], 4294967168 }
 0x13b   :  { %249 = vsyncpa [#allocation3], 1 }
 0x13c   :  { %250 = vsyncpa [#allocation6], 1 }
 0x13d   :  { %251 = vsyncpa [#allocation4], 1 }

</bundles_post_ra>
